<compile_context>
chip_gen: v7x
topology: tpu7x:2x2x1
jax: 0.10.0
libtpu: 0.0.40
codegen_flags: <defaults>
</compile_context>

<pallas_src>
import math
import functools

import jax
import jax.numpy as jnp
import numpy as np
from jax import lax
from jax.experimental import pallas as pl
from jax.experimental.pallas import tpu as pltpu


def _layernorm(x, gamma, beta, eps=1e-5):
    # PyTorch nn.LayerNorm: biased variance over last dim, eps inside rsqrt.
    mean = jnp.mean(x, axis=-1, keepdims=True)
    var = jnp.mean((x - mean) ** 2, axis=-1, keepdims=True)
    return (x - mean) * lax.rsqrt(var + eps) * gamma + beta


def _gelu_exact(x):
    # PyTorch nn.GELU() default: exact erf-based GELU (f32).
    return 0.5 * x * (1.0 + lax.erf(x * (1.0 / math.sqrt(2.0))))


_NT = (((1,), (1,)), ((), ()))   # dot_general dims for  A @ B^T


# --------------------- pass 1: LayerNorm1 + QKV projection ---------------------
def ln_qkv_kernel(x_ref,                 # (tproj, C)  input rows (f32)
                  g1_ref, be1_ref,       # (1, C)      LayerNorm1 gamma/beta (f32)
                  wqkv_ref,              # (C, 3C)     qkv.weight^T, scale folded into Q (bf16)
                  q_ref, k_ref, v_ref,   # (H, tproj, hd) bf16 head-major outputs
                  *, num_heads, head_dim):
    C = num_heads * head_dim
    ln = _layernorm(x_ref[...].astype(jnp.float32), g1_ref[0], be1_ref[0])
    ln = ln.astype(jnp.bfloat16)
    # One full-width MXU matmul for Q, K and V together (f32 accumulation).
    qkv = jnp.dot(ln, wqkv_ref[...], preferred_element_type=jnp.float32)   # (tproj, 3C)
    qkv = qkv.astype(jnp.bfloat16)
    # Split into head-major layout once here (static lane slices), so the
    # attention pass never slices the lane axis.
    for h in range(num_heads):
        q_ref[h] = qkv[:, 0 * C + h * head_dim: 0 * C + (h + 1) * head_dim]
        k_ref[h] = qkv[:, 1 * C + h * head_dim: 1 * C + (h + 1) * head_dim]
        v_ref[h] = qkv[:, 2 * C + h * head_dim: 2 * C + (h + 1) * head_dim]


# --------- pass 2: attention + proj + residual + LayerNorm2 + GELU MLP ---------
def attn_mlp_kernel(x_ref,               # (tq, C)      input rows for this q-tile (f32)
                    q_ref,               # (H, tq, hd)  bf16, scale pre-folded
                    k_ref, v_ref,        # (H, N, hd)   bf16, resident per batch
                    wp_ref,              # (H, hd, C)   proj.weight^T per head (bf16)
                    bproj_ref,           # (1, C)       proj bias (f32)
                    g2_ref, be2_ref,     # (1, C)       LayerNorm2 gamma/beta (f32)
                    w1_ref, b1_ref,      # (C, Hm) bf16 / (1, Hm) f32
                    w2_ref, b2_ref,      # (Hm, C) bf16 / (1, C)  f32
                    o_ref,               # (tq, C)      output tile
                    acc_ref,             # (tq, C)      f32 scratch accumulator
                    *, num_heads):
    # ---- multi-head attention; concat over heads folded into the projection ----
    for h in range(num_heads):           # static unroll: H is small & static
        q_h = q_ref[h]                   # (tq, hd) bf16
        k_h = k_ref[h]                   # (N,  hd) bf16
        v_h = v_ref[h]                   # (N,  hd) bf16
        s = lax.dot_general(q_h, k_h, _NT, preferred_element_type=jnp.float32)  # (tq, N)
        s = s - jnp.max(s, axis=-1, keepdims=True)
        p = jnp.exp(s)                                                          # unnormalized
        denom = jnp.sum(p, axis=-1, keepdims=True)                              # (tq, 1)
        o_h = jnp.dot(p.astype(jnp.bfloat16), v_h,
                      preferred_element_type=jnp.float32)                       # (tq, hd)
        # deferred softmax normalization on the (tq, hd) tile, not (tq, N)
        o_h = o_h * pl.reciprocal(denom, approx=True)
        # attention dropout: identity in eval mode
        contrib = jnp.dot(o_h.astype(jnp.bfloat16), wp_ref[h],
                          preferred_element_type=jnp.float32)                   # (tq, C)
        if h == 0:
            acc_ref[...] = contrib
        else:
            acc_ref[...] += contrib

    # ---- proj bias + residual 1 + LayerNorm2 + GELU MLP + residual 2 ----
    x_q = x_ref[...].astype(jnp.float32)
    x1 = x_q + acc_ref[...] + bproj_ref[0]                 # proj dropout = identity
    xn2 = _layernorm(x1, g2_ref[0], be2_ref[0]).astype(jnp.bfloat16)
    h1 = jnp.dot(xn2, w1_ref[...], preferred_element_type=jnp.float32) + b1_ref[0]
    h1 = _gelu_exact(h1).astype(jnp.bfloat16)
    h2 = jnp.dot(h1, w2_ref[...], preferred_element_type=jnp.float32) + b2_ref[0]
    o_ref[...] = (x1 + h2).astype(o_ref.dtype)             # mlp dropout = identity


# --------------------------------- wrapper ---------------------------------
def _pick_tile(n, pref, mult):
    """Largest tile <= pref that divides n and is a multiple of `mult` (else n)."""
    if n <= pref:
        return n
    t = (pref // mult) * mult
    while t >= mult:
        if n % t == 0:
            return t
        t -= mult
    return n


def _vmem_limit_bytes():
    # Generation-aware VMEM budget: ~75% of physical (leave headroom for
    # Mosaic internal scratch / semaphores; v7x has only 64 MiB per core).
    try:
        phys = pltpu.get_tpu_info().vmem_capacity_bytes
    except Exception:
        phys = 128 * 1024 * 1024
    return int(phys * 3 // 4)


def efficient_transformer_block(x, params, *, num_heads, tq=None, tproj=None):
    B, N, C = x.shape
    assert C % num_heads == 0
    hd = C // num_heads
    Hm = params["w1"].shape[0]            # fc1.weight: (Hm, C)
    scale = float(hd) ** -0.5
    bf16 = jnp.bfloat16

    if tproj is None:
        tproj = _pick_tile(N, 256, 8)     # seq tile for the QKV-projection pass
    if tq is None:
        tq = _pick_tile(N, 256, 16)       # query tile for the attention pass
    assert N % tproj == 0 and (tproj == N or tproj % 8 == 0)
    assert N % tq == 0 and (tq == N or tq % 16 == 0)
    nt, nq = N // tproj, N // tq

    # ---- parameter prep (PyTorch layouts -> kernel layouts), all host-side ----
    wqkv = params["wqkv"]                                             # (3C, C) [out, in]
    # fold the 1/sqrt(hd) attention scale into the Q weights (zero runtime cost)
    wqkv_t = jnp.concatenate([wqkv[:C] * scale, wqkv[C:]], axis=0).T.astype(bf16)  # (C, 3C)
    wp = params["wproj"].T.reshape(num_heads, hd, C).astype(bf16)     # proj.weight^T per head
    w1 = params["w1"].T.astype(bf16)                                  # (C, Hm)
    w2 = params["w2"].T.astype(bf16)                                  # (Hm, C)

    row2 = lambda v: v.reshape(1, -1).astype(jnp.float32)
    g1, be1 = row2(params["ln1_g"]), row2(params["ln1_b"])
    g2, be2 = row2(params["ln2_g"]), row2(params["ln2_b"])
    bproj, b1, b2 = row2(params["bproj"]), row2(params["b1"]), row2(params["b2"])

    vmem_limit = _vmem_limit_bytes()

    def const(shape):                      # block whose index never advances
        return pl.BlockSpec(shape, lambda b, i: (0,) * len(shape))

    # ----------------- pass 1: LN1 + QKV projection (once per token) -----------------
    qkv_kernel = functools.partial(ln_qkv_kernel, num_heads=num_heads, head_dim=hd)
    head_major = jax.ShapeDtypeStruct((B, num_heads, N, hd), bf16)

    q_all, k_all, v_all = pl.pallas_call(
        qkv_kernel,
        out_shape=(head_major, head_major, head_major),
        grid=(B, nt),
        in_specs=[
            pl.BlockSpec((pl.Squeezed(), tproj, C), lambda b, i: (b, i, 0)),   # x rows
            const((1, C)), const((1, C)),                                      # ln1 gamma/beta
            const((C, 3 * C)),                                                 # qkv.weight^T
        ],
        out_specs=tuple(
            pl.BlockSpec((pl.Squeezed(), num_heads, tproj, hd),
                         lambda b, i: (b, 0, i, 0))
            for _ in range(3)),
        compiler_params=pltpu.CompilerParams(
            dimension_semantics=("parallel", "parallel"),
            vmem_limit_bytes=vmem_limit),
    )(x, g1, be1, wqkv_t)

    # ------------- pass 2: attention + proj + residuals + LN2 + GELU MLP -------------
    attn_kernel = functools.partial(attn_mlp_kernel, num_heads=num_heads)

    return pl.pallas_call(
        attn_kernel,
        out_shape=jax.ShapeDtypeStruct((B, N, C), x.dtype),
        grid=(B, nq),
        in_specs=[
            pl.BlockSpec((pl.Squeezed(), tq, C), lambda b, i: (b, i, 0)),              # x (q rows)
            pl.BlockSpec((pl.Squeezed(), num_heads, tq, hd), lambda b, i: (b, 0, i, 0)),  # Q tile
            pl.BlockSpec((pl.Squeezed(), num_heads, N, hd), lambda b, i: (b, 0, 0, 0)),   # K (batch)
            pl.BlockSpec((pl.Squeezed(), num_heads, N, hd), lambda b, i: (b, 0, 0, 0)),   # V (batch)
            const((num_heads, hd, C)),                                                 # proj.W^T
            const((1, C)),                                                             # proj bias
            const((1, C)), const((1, C)),                                              # ln2 g/b
            const((C, Hm)), const((1, Hm)),                                            # fc1 w/b
            const((Hm, C)), const((1, C)),                                             # fc2 w/b
        ],
        out_specs=pl.BlockSpec((pl.Squeezed(), tq, C), lambda b, i: (b, i, 0)),
        scratch_shapes=[pltpu.VMEM((tq, C), jnp.float32)],        # attention accumulator
        compiler_params=pltpu.CompilerParams(
            dimension_semantics=("parallel", "parallel"),
            vmem_limit_bytes=vmem_limit),
    )(x, q_all, k_all, v_all, wp, bproj, g2, be2, w1, b1, w2, b2)


# --------------------------- plain-JAX f32 reference ---------------------------
def reference_block(x, params, *, num_heads):
    B, N, C = x.shape
    hd = C // num_heads
    xn = _layernorm(x, params["ln1_g"], params["ln1_b"])
    qkv = xn @ params["wqkv"].T                                # (B, N, 3C)
    qkv = qkv.reshape(B, N, 3, num_heads, hd).transpose(2, 0, 3, 1, 4)
    q, k, v = qkv[0], qkv[1], qkv[2]                           # (B, H, N, hd)
    s = jnp.einsum("bhnd,bhmd->bhnm", q, k) * (hd ** -0.5)
    p = jax.nn.softmax(s, axis=-1)
    a = jnp.einsum("bhnm,bhmd->bhnd", p, v)
    a = a.transpose(0, 2, 1, 3).reshape(B, N, C)
    a = a @ params["wproj"].T + params["bproj"]
    x = x + a
    xn2 = _layernorm(x, params["ln2_g"], params["ln2_b"])
    h1 = _gelu_exact(xn2 @ params["w1"].T + params["b1"])
    return x + (h1 @ params["w2"].T + params["b2"])


def init_params(key, C, mlp_ratio=4.0):
    """Parameters in PyTorch nn.Linear / nn.LayerNorm layouts."""
    Hm = int(C * mlp_ratio)
    ks = jax.random.split(key, 6)
    s = 0.02
    return {
        "ln1_g": jnp.ones((C,), jnp.float32),
        "ln1_b": jnp.zeros((C,), jnp.float32),
        "wqkv": s * jax.random.normal(ks[0], (3 * C, C), jnp.float32),   # qkv.weight
        "wproj": s * jax.random.normal(ks[1], (C, C), jnp.float32),      # proj.weight
        "bproj": s * jax.random.normal(ks[2], (C,), jnp.float32),
        "ln2_g": jnp.ones((C,), jnp.float32),
        "ln2_b": jnp.zeros((C,), jnp.float32),
        "w1": s * jax.random.normal(ks[3], (Hm, C), jnp.float32),        # fc1.weight
        "b1": s * jax.random.normal(ks[4], (Hm,), jnp.float32),
        "w2": s * jax.random.normal(ks[5], (C, Hm), jnp.float32),        # fc2.weight
        "b2": jnp.zeros((C,), jnp.float32),
    }


if __name__ == "__main__":
    key = jax.random.PRNGKey(0)

    # Case 1: single-tile path (N == tq == tproj).
    B, N, C, num_heads = 2, 8, 32, 4      # embed_dim=32, head_dim=8, mlp_hidden=128
    kx, kp, key = jax.random.split(key, 3)
    x = jax.random.normal(kx, (B, N, C), jnp.float32)
    params = init_params(kp, C)
    out = jax.block_until_ready(efficient_transformer_block(x, params, num_heads=num_heads))
    ref = reference_block(x, params, num_heads=num_heads)
    # bf16 MXU inputs (f32 accumulation) -> loosened f32 reference tolerance.
    np.testing.assert_allclose(np.asarray(out), np.asarray(ref), rtol=2e-2, atol=2e-2)

    # Case 2: tiled path (multiple q-tiles and projection tiles per sequence).
    B2, N2, C2, H2 = 1, 64, 64, 4         # head_dim=16, mlp_hidden=256
    kx2, kp2 = jax.random.split(key)
    x2 = jax.random.normal(kx2, (B2, N2, C2), jnp.float32)
    params2 = init_params(kp2, C2)
    out2 = jax.block_until_ready(
        efficient_transformer_block(x2, params2, num_heads=H2, tq=16, tproj=32))
    ref2 = reference_block(x2, params2, num_heads=H2)
    np.testing.assert_allclose(np.asarray(out2), np.asarray(ref2), rtol=2e-2, atol=2e-2)

    print("KERNEL_OK")
</pallas_src>

<mosaic_0001>
module attributes {stable_mosaic.version = 11 : i64} {
  func.func @ln_qkv_kernel(%arg0: i32, %arg1: i32, %arg2: memref<1x8x32xf32, #tpu.memory_space<vmem>>, %arg3: memref<1x32xf32, #tpu.memory_space<vmem>>, %arg4: memref<1x32xf32, #tpu.memory_space<vmem>>, %arg5: memref<32x96xbf16, #tpu.memory_space<vmem>>, %arg6: memref<1x4x8x8xbf16, #tpu.memory_space<vmem>>, %arg7: memref<1x4x8x8xbf16, #tpu.memory_space<vmem>>, %arg8: memref<1x4x8x8xbf16, #tpu.memory_space<vmem>>) attributes {dimension_semantics = [#tpu.dimension_semantics<parallel>, #tpu.dimension_semantics<parallel>], iteration_bounds = array<i64: 2, 1>, scalar_prefetch = 0 : i64, scratch_operands = 0 : i64, tpu.core_type = #tpu.core_type<tc>, window_params = [{transform_indices = @transform_0, window_bounds = array<i64: 1, 8, 32>}, {pipeline_mode = #tpu.pipeline_mode<synchronous>, transform_indices = @transform_1, window_bounds = array<i64: 1, 32>}, {pipeline_mode = #tpu.pipeline_mode<synchronous>, transform_indices = @transform_2, window_bounds = array<i64: 1, 32>}, {pipeline_mode = #tpu.pipeline_mode<synchronous>, transform_indices = @transform_3, window_bounds = array<i64: 32, 96>}, {transform_indices = @transform_4, window_bounds = array<i64: 1, 4, 8, 8>}, {transform_indices = @transform_5, window_bounds = array<i64: 1, 4, 8, 8>}, {transform_indices = @transform_6, window_bounds = array<i64: 1, 4, 8, 8>}]} {
    %c0 = arith.constant 0 : index
    %c0_0 = arith.constant 0 : index
    %c0_1 = arith.constant 0 : index
    %0 = vector.load %arg2[%c0, %c0_0, %c0_1] : memref<1x8x32xf32, #tpu.memory_space<vmem>>, vector<1x8x32xf32>
    %1 = vector.shape_cast %0 : vector<1x8x32xf32> to vector<8x32xf32>
    %c0_2 = arith.constant 0 : index
    %c0_3 = arith.constant 0 : index
    %2 = vector.load %arg3[%c0_2, %c0_3] : memref<1x32xf32, #tpu.memory_space<vmem>>, vector<1x32xf32>
    %3 = vector.shape_cast %2 : vector<1x32xf32> to vector<32xf32>
    %c0_4 = arith.constant 0 : index
    %c0_5 = arith.constant 0 : index
    %4 = vector.load %arg4[%c0_4, %c0_5] : memref<1x32xf32, #tpu.memory_space<vmem>>, vector<1x32xf32>
    %5 = vector.shape_cast %4 : vector<1x32xf32> to vector<32xf32>
    %cst = arith.constant dense<0.000000e+00> : vector<8xf32>
    %6 = vector.multi_reduction <add>, %1, %cst [1] : vector<8x32xf32> to vector<8xf32>
    %7 = vector.shape_cast %6 : vector<8xf32> to vector<8x1xf32>
    %cst_6 = arith.constant 3.200000e+01 : f32
    %8 = vector.broadcast %cst_6 : f32 to vector<8x1xf32>
    %9 = arith.divf %7, %8 : vector<8x1xf32>
    %10 = vector.broadcast %9 : vector<8x1xf32> to vector<8x32xf32>
    %11 = arith.subf %1, %10 : vector<8x32xf32>
    %12 = arith.mulf %11, %11 : vector<8x32xf32>
    %cst_7 = arith.constant dense<0.000000e+00> : vector<8xf32>
    %13 = vector.multi_reduction <add>, %12, %cst_7 [1] : vector<8x32xf32> to vector<8xf32>
    %14 = vector.shape_cast %13 : vector<8xf32> to vector<8x1xf32>
    %cst_8 = arith.constant 3.200000e+01 : f32
    %15 = vector.broadcast %cst_8 : f32 to vector<8x1xf32>
    %16 = arith.divf %14, %15 : vector<8x1xf32>
    %17 = vector.broadcast %9 : vector<8x1xf32> to vector<8x32xf32>
    %18 = arith.subf %1, %17 : vector<8x32xf32>
    %cst_9 = arith.constant 9.99999974E-6 : f32
    %19 = vector.broadcast %cst_9 : f32 to vector<8x1xf32>
    %20 = arith.addf %16, %19 : vector<8x1xf32>
    %21 = math.rsqrt %20 : vector<8x1xf32>
    %22 = vector.broadcast %21 : vector<8x1xf32> to vector<8x32xf32>
    %23 = arith.mulf %18, %22 : vector<8x32xf32>
    %24 = vector.shape_cast %3 : vector<32xf32> to vector<1x32xf32>
    %25 = vector.broadcast %24 : vector<1x32xf32> to vector<8x32xf32>
    %26 = arith.mulf %23, %25 : vector<8x32xf32>
    %27 = vector.shape_cast %5 : vector<32xf32> to vector<1x32xf32>
    %28 = vector.broadcast %27 : vector<1x32xf32> to vector<8x32xf32>
    %29 = arith.addf %26, %28 : vector<8x32xf32>
    %30 = arith.truncf %29 : vector<8x32xf32> to vector<8x32xbf16>
    %c0_10 = arith.constant 0 : index
    %c0_11 = arith.constant 0 : index
    %31 = vector.load %arg5[%c0_10, %c0_11] : memref<32x96xbf16, #tpu.memory_space<vmem>>, vector<32x96xbf16>
    %cst_12 = arith.constant dense<0.000000e+00> : vector<8x96xf32>
    %32 = tpu.matmul %30, %31, %cst_12 {dimension_numbers = #tpu.dot_dimension_numbers<[1], [0], [0], [1], [0, 0, 1, 1], [], []>} : vector<8x32xbf16>, vector<32x96xbf16>, vector<8x96xf32> -> vector<8x96xf32>
    %33 = arith.truncf %32 : vector<8x96xf32> to vector<8x96xbf16>
    %34 = vector.extract_strided_slice %33 {offsets = [0, 0], sizes = [8, 8], strides = [1, 1]} : vector<8x96xbf16> to vector<8x8xbf16>
    %c0_13 = arith.constant 0 : index
    %c0_14 = arith.constant 0 : index
    %c0_15 = arith.constant 0 : index
    %c0_16 = arith.constant 0 : index
    %35 = vector.load %arg6[%c0_13, %c0_14, %c0_15, %c0_16] : memref<1x4x8x8xbf16, #tpu.memory_space<vmem>>, vector<1x1x8x8xbf16>
    %36 = vector.shape_cast %35 : vector<1x1x8x8xbf16> to vector<8x8xbf16>
    %37 = vector.shape_cast %34 : vector<8x8xbf16> to vector<1x1x8x8xbf16>
    tpu.vector_store %arg6[%c0_13, %c0_14, %c0_15, %c0_16], %37 {strides = array<i32>} : memref<1x4x8x8xbf16, #tpu.memory_space<vmem>>, vector<1x1x8x8xbf16>,
    %38 = vector.extract_strided_slice %33 {offsets = [0, 32], sizes = [8, 8], strides = [1, 1]} : vector<8x96xbf16> to vector<8x8xbf16>
    %c0_17 = arith.constant 0 : index
    %c0_18 = arith.constant 0 : index
    %c0_19 = arith.constant 0 : index
    %c0_20 = arith.constant 0 : index
    %39 = vector.load %arg7[%c0_17, %c0_18, %c0_19, %c0_20] : memref<1x4x8x8xbf16, #tpu.memory_space<vmem>>, vector<1x1x8x8xbf16>
    %40 = vector.shape_cast %39 : vector<1x1x8x8xbf16> to vector<8x8xbf16>
    %41 = vector.shape_cast %38 : vector<8x8xbf16> to vector<1x1x8x8xbf16>
    tpu.vector_store %arg7[%c0_17, %c0_18, %c0_19, %c0_20], %41 {strides = array<i32>} : memref<1x4x8x8xbf16, #tpu.memory_space<vmem>>, vector<1x1x8x8xbf16>,
    %42 = vector.extract_strided_slice %33 {offsets = [0, 64], sizes = [8, 8], strides = [1, 1]} : vector<8x96xbf16> to vector<8x8xbf16>
    %c0_21 = arith.constant 0 : index
    %c0_22 = arith.constant 0 : index
    %c0_23 = arith.constant 0 : index
    %c0_24 = arith.constant 0 : index
    %43 = vector.load %arg8[%c0_21, %c0_22, %c0_23, %c0_24] : memref<1x4x8x8xbf16, #tpu.memory_space<vmem>>, vector<1x1x8x8xbf16>
    %44 = vector.shape_cast %43 : vector<1x1x8x8xbf16> to vector<8x8xbf16>
    %45 = vector.shape_cast %42 : vector<8x8xbf16> to vector<1x1x8x8xbf16>
    tpu.vector_store %arg8[%c0_21, %c0_22, %c0_23, %c0_24], %45 {strides = array<i32>} : memref<1x4x8x8xbf16, #tpu.memory_space<vmem>>, vector<1x1x8x8xbf16>,
    %46 = vector.extract_strided_slice %33 {offsets = [0, 8], sizes = [8, 8], strides = [1, 1]} : vector<8x96xbf16> to vector<8x8xbf16>
    %c0_25 = arith.constant 0 : index
    %c1 = arith.constant 1 : index
    %c0_26 = arith.constant 0 : index
    %c0_27 = arith.constant 0 : index
    %47 = vector.load %arg6[%c0_25, %c1, %c0_26, %c0_27] : memref<1x4x8x8xbf16, #tpu.memory_space<vmem>>, vector<1x1x8x8xbf16>
    %48 = vector.shape_cast %47 : vector<1x1x8x8xbf16> to vector<8x8xbf16>
    %49 = vector.shape_cast %46 : vector<8x8xbf16> to vector<1x1x8x8xbf16>
    tpu.vector_store %arg6[%c0_25, %c1, %c0_26, %c0_27], %49 {strides = array<i32>} : memref<1x4x8x8xbf16, #tpu.memory_space<vmem>>, vector<1x1x8x8xbf16>,
    %50 = vector.extract_strided_slice %33 {offsets = [0, 40], sizes = [8, 8], strides = [1, 1]} : vector<8x96xbf16> to vector<8x8xbf16>
    %c0_28 = arith.constant 0 : index
    %c1_29 = arith.constant 1 : index
    %c0_30 = arith.constant 0 : index
    %c0_31 = arith.constant 0 : index
    %51 = vector.load %arg7[%c0_28, %c1_29, %c0_30, %c0_31] : memref<1x4x8x8xbf16, #tpu.memory_space<vmem>>, vector<1x1x8x8xbf16>
    %52 = vector.shape_cast %51 : vector<1x1x8x8xbf16> to vector<8x8xbf16>
    %53 = vector.shape_cast %50 : vector<8x8xbf16> to vector<1x1x8x8xbf16>
    tpu.vector_store %arg7[%c0_28, %c1_29, %c0_30, %c0_31], %53 {strides = array<i32>} : memref<1x4x8x8xbf16, #tpu.memory_space<vmem>>, vector<1x1x8x8xbf16>,
    %54 = vector.extract_strided_slice %33 {offsets = [0, 72], sizes = [8, 8], strides = [1, 1]} : vector<8x96xbf16> to vector<8x8xbf16>
    %c0_32 = arith.constant 0 : index
    %c1_33 = arith.constant 1 : index
    %c0_34 = arith.constant 0 : index
    %c0_35 = arith.constant 0 : index
    %55 = vector.load %arg8[%c0_32, %c1_33, %c0_34, %c0_35] : memref<1x4x8x8xbf16, #tpu.memory_space<vmem>>, vector<1x1x8x8xbf16>
    %56 = vector.shape_cast %55 : vector<1x1x8x8xbf16> to vector<8x8xbf16>
    %57 = vector.shape_cast %54 : vector<8x8xbf16> to vector<1x1x8x8xbf16>
    tpu.vector_store %arg8[%c0_32, %c1_33, %c0_34, %c0_35], %57 {strides = array<i32>} : memref<1x4x8x8xbf16, #tpu.memory_space<vmem>>, vector<1x1x8x8xbf16>,
    %58 = vector.extract_strided_slice %33 {offsets = [0, 16], sizes = [8, 8], strides = [1, 1]} : vector<8x96xbf16> to vector<8x8xbf16>
    %c0_36 = arith.constant 0 : index
    %c2 = arith.constant 2 : index
    %c0_37 = arith.constant 0 : index
    %c0_38 = arith.constant 0 : index
    %59 = vector.load %arg6[%c0_36, %c2, %c0_37, %c0_38] : memref<1x4x8x8xbf16, #tpu.memory_space<vmem>>, vector<1x1x8x8xbf16>
    %60 = vector.shape_cast %59 : vector<1x1x8x8xbf16> to vector<8x8xbf16>
    %61 = vector.shape_cast %58 : vector<8x8xbf16> to vector<1x1x8x8xbf16>
    tpu.vector_store %arg6[%c0_36, %c2, %c0_37, %c0_38], %61 {strides = array<i32>} : memref<1x4x8x8xbf16, #tpu.memory_space<vmem>>, vector<1x1x8x8xbf16>,
    %62 = vector.extract_strided_slice %33 {offsets = [0, 48], sizes = [8, 8], strides = [1, 1]} : vector<8x96xbf16> to vector<8x8xbf16>
    %c0_39 = arith.constant 0 : index
    %c2_40 = arith.constant 2 : index
    %c0_41 = arith.constant 0 : index
    %c0_42 = arith.constant 0 : index
    %63 = vector.load %arg7[%c0_39, %c2_40, %c0_41, %c0_42] : memref<1x4x8x8xbf16, #tpu.memory_space<vmem>>, vector<1x1x8x8xbf16>
    %64 = vector.shape_cast %63 : vector<1x1x8x8xbf16> to vector<8x8xbf16>
    %65 = vector.shape_cast %62 : vector<8x8xbf16> to vector<1x1x8x8xbf16>
    tpu.vector_store %arg7[%c0_39, %c2_40, %c0_41, %c0_42], %65 {strides = array<i32>} : memref<1x4x8x8xbf16, #tpu.memory_space<vmem>>, vector<1x1x8x8xbf16>,
    %66 = vector.extract_strided_slice %33 {offsets = [0, 80], sizes = [8, 8], strides = [1, 1]} : vector<8x96xbf16> to vector<8x8xbf16>
    %c0_43 = arith.constant 0 : index
    %c2_44 = arith.constant 2 : index
    %c0_45 = arith.constant 0 : index
    %c0_46 = arith.constant 0 : index
    %67 = vector.load %arg8[%c0_43, %c2_44, %c0_45, %c0_46] : memref<1x4x8x8xbf16, #tpu.memory_space<vmem>>, vector<1x1x8x8xbf16>
    %68 = vector.shape_cast %67 : vector<1x1x8x8xbf16> to vector<8x8xbf16>
    %69 = vector.shape_cast %66 : vector<8x8xbf16> to vector<1x1x8x8xbf16>
    tpu.vector_store %arg8[%c0_43, %c2_44, %c0_45, %c0_46], %69 {strides = array<i32>} : memref<1x4x8x8xbf16, #tpu.memory_space<vmem>>, vector<1x1x8x8xbf16>,
    %70 = vector.extract_strided_slice %33 {offsets = [0, 24], sizes = [8, 8], strides = [1, 1]} : vector<8x96xbf16> to vector<8x8xbf16>
    %c0_47 = arith.constant 0 : index
    %c3 = arith.constant 3 : index
    %c0_48 = arith.constant 0 : index
    %c0_49 = arith.constant 0 : index
    %71 = vector.load %arg6[%c0_47, %c3, %c0_48, %c0_49] : memref<1x4x8x8xbf16, #tpu.memory_space<vmem>>, vector<1x1x8x8xbf16>
    %72 = vector.shape_cast %71 : vector<1x1x8x8xbf16> to vector<8x8xbf16>
    %73 = vector.shape_cast %70 : vector<8x8xbf16> to vector<1x1x8x8xbf16>
    tpu.vector_store %arg6[%c0_47, %c3, %c0_48, %c0_49], %73 {strides = array<i32>} : memref<1x4x8x8xbf16, #tpu.memory_space<vmem>>, vector<1x1x8x8xbf16>,
    %74 = vector.extract_strided_slice %33 {offsets = [0, 56], sizes = [8, 8], strides = [1, 1]} : vector<8x96xbf16> to vector<8x8xbf16>
    %c0_50 = arith.constant 0 : index
    %c3_51 = arith.constant 3 : index
    %c0_52 = arith.constant 0 : index
    %c0_53 = arith.constant 0 : index
    %75 = vector.load %arg7[%c0_50, %c3_51, %c0_52, %c0_53] : memref<1x4x8x8xbf16, #tpu.memory_space<vmem>>, vector<1x1x8x8xbf16>
    %76 = vector.shape_cast %75 : vector<1x1x8x8xbf16> to vector<8x8xbf16>
    %77 = vector.shape_cast %74 : vector<8x8xbf16> to vector<1x1x8x8xbf16>
    tpu.vector_store %arg7[%c0_50, %c3_51, %c0_52, %c0_53], %77 {strides = array<i32>} : memref<1x4x8x8xbf16, #tpu.memory_space<vmem>>, vector<1x1x8x8xbf16>,
    %78 = vector.extract_strided_slice %33 {offsets = [0, 88], sizes = [8, 8], strides = [1, 1]} : vector<8x96xbf16> to vector<8x8xbf16>
    %c0_54 = arith.constant 0 : index
    %c3_55 = arith.constant 3 : index
    %c0_56 = arith.constant 0 : index
    %c0_57 = arith.constant 0 : index
    %79 = vector.load %arg8[%c0_54, %c3_55, %c0_56, %c0_57] : memref<1x4x8x8xbf16, #tpu.memory_space<vmem>>, vector<1x1x8x8xbf16>
    %80 = vector.shape_cast %79 : vector<1x1x8x8xbf16> to vector<8x8xbf16>
    %81 = vector.shape_cast %78 : vector<8x8xbf16> to vector<1x1x8x8xbf16>
    tpu.vector_store %arg8[%c0_54, %c3_55, %c0_56, %c0_57], %81 {strides = array<i32>} : memref<1x4x8x8xbf16, #tpu.memory_space<vmem>>, vector<1x1x8x8xbf16>,
    return
  }
  func.func @transform_0(%arg0: i32, %arg1: i32) -> (i32, i32, i32) {
    %c0_i32 = arith.constant 0 : i32
    %c0_i32_0 = arith.constant 0 : i32
    return %arg0, %arg1, %c0_i32 : i32, i32, i32
  }
  func.func @transform_1(%arg0: i32, %arg1: i32) -> (i32, i32) {
    %c0_i32 = arith.constant 0 : i32
    %c0_i32_0 = arith.constant 0 : i32
    %c0_i32_1 = arith.constant 0 : i32
    return %c0_i32, %c0_i32_0 : i32, i32
  }
  func.func @transform_2(%arg0: i32, %arg1: i32) -> (i32, i32) {
    %c0_i32 = arith.constant 0 : i32
    %c0_i32_0 = arith.constant 0 : i32
    %c0_i32_1 = arith.constant 0 : i32
    return %c0_i32, %c0_i32_0 : i32, i32
  }
  func.func @transform_3(%arg0: i32, %arg1: i32) -> (i32, i32) {
    %c0_i32 = arith.constant 0 : i32
    %c0_i32_0 = arith.constant 0 : i32
    %c0_i32_1 = arith.constant 0 : i32
    return %c0_i32, %c0_i32_0 : i32, i32
  }
  func.func @transform_4(%arg0: i32, %arg1: i32) -> (i32, i32, i32, i32) {
    %c0_i32 = arith.constant 0 : i32
    %c0_i32_0 = arith.constant 0 : i32
    %c0_i32_1 = arith.constant 0 : i32
    return %arg0, %c0_i32, %arg1, %c0_i32_0 : i32, i32, i32, i32
  }
  func.func @transform_5(%arg0: i32, %arg1: i32) -> (i32, i32, i32, i32) {
    %c0_i32 = arith.constant 0 : i32
    %c0_i32_0 = arith.constant 0 : i32
    %c0_i32_1 = arith.constant 0 : i32
    return %arg0, %c0_i32, %arg1, %c0_i32_0 : i32, i32, i32, i32
  }
  func.func @transform_6(%arg0: i32, %arg1: i32) -> (i32, i32, i32, i32) {
    %c0_i32 = arith.constant 0 : i32
    %c0_i32_0 = arith.constant 0 : i32
    %c0_i32_1 = arith.constant 0 : i32
    return %arg0, %c0_i32, %arg1, %c0_i32_0 : i32, i32, i32, i32
  }
}

</mosaic_0001>

<bundles_post_ra>
// kernel: tpu_custom_call.1
= control target key start
LH: loop header
LB: loop body
LE: loop exit
PB: predicated region body
PF: predicated region fallthrough
CT: control target
= control target key end

     0   :  { %12 = vsyncpa [#allocation3], 0  ;;  %s1626_s0 = inlined_call_operand.hbm [shape: f32[2,8,32], index: 0, kind: input, shape index: {}]   ;;  %s1627_s1 = inlined_call_operand.hbm [shape: f32[1,32], index: 1, kind: input, shape index: {}]   ;;  %s1628_s2 = inlined_call_operand.hbm [shape: f32[1,32], index: 2, kind: input, shape index: {}]   ;;  %s1629_s3 = inlined_call_operand.hbm [shape: bf16[32,96], index: 3, kind: input, shape index: {}]   ;;  %s1630_s4 = inlined_call_operand.hbm [shape: bf16[2,4,8,8], index: 4, kind: output, shape index: {0}]   ;;  %s1631_s5 = inlined_call_operand.hbm [shape: bf16[2,4,8,8], index: 5, kind: output, shape index: {1}]   ;;  %s1632_s6 = inlined_call_operand.hbm [shape: bf16[2,4,8,8], index: 6, kind: output, shape index: {2}]  }
   0x1   :  { %14 = vsyncpa [#allocation3 + $0x1], 0 }
   0x2   :  { %15 = vsyncpa [#allocation6], 0 }
   0x3   :  { %16 = vsyncpa [#allocation9], 0 }
   0x4   :  { %17 = vsyncpa [#allocation4], 0 }
   0x5   :  { %19 = vsyncpa [#allocation4 + $0x1], 0 }
   0x6   :  { %20 = vsyncpa [#allocation12], 0 }
   0x7   :  { %22 = vsyncpa [#allocation12 + $0x1], 0  ;;  %s1240_s21 = smov 0   ;;  %s1242_s22 = smov 0  }
   0x8   :  { %s1244_s23 = smov 0   ;;  %s1246_s24 = smov 0  }
   0x9   :  { %s1248_s25 = smov 0   ;;  %s1250_s26 = smov 0  }
   0xa LB: > { %s1271_s27 = sadd.s32 4294967295, %s1180_s26   ;;  %s1636_s28 = sadd.s32 4294967294, %s1180_s26   ;;  %s1180_s26 = sphi %s1250_s26, %s28_s26   ;;  %s1176_s25 = sphi %s1248_s25, %s1665_s25   ;;  %s1172_s24 = sphi %s1246_s24, %s1664_s24   ;;  %s1168_s23 = sphi %s1244_s23, %s1663_s23   ;;  %s1164_s22 = sphi %s1242_s22, %s1662_s22   ;;  %s1160_s21 = sphi %s1240_s21, %s1661_s21  }
   0xb   : > { %p62_p0 = scmp.ne.s32.totalorder %s1164_s22, %s1160_s21  ;;  %p1633_p1 = scmp.eq.s32.totalorder %s1271_s27, 0 }
   0xc   : > { %p157_p3 = scmp.eq.s32.totalorder %s1636_s28, 1  ;;  %p737_p5 = scmp.ge.s32.totalorder %s1180_s26, 1 }
   0xd   : > { %p1282_p4 = por %p1633_p1, %p62_p0  ;;  %p220_p7 = scmp.lt.s32.totalorder %s1180_s26, 3 }
   0xe   : > { %p1287_p6 = por %p157_p3, %p62_p0  ;;  %s1182_s8 = smov [#allocation5]  }
   0xf   : > { %s1641_s29 = scalar_select %p1282_p4, 1, 0 }
  0x10   : > { %s1642_s30 = scalar_select %p1287_p6, 1, 0 }
  0x11   : > { %p1292_p8 = pnand %p737_p5, %p220_p7  ;;  %s233_s9 = sshll.u32 %s1182_s8, 4  ;;  %s234_s9 = int_to_ptr.vmem [resolvable:$true] %s233_s9 }
  0x12   : > { %s1183_s10 = smov [#allocation7]   ;;  %s1184_s13 = smov [#allocation8]  }
  0x13   : > { %s1643_s7 = scalar_select %p1292_p8, 1, 0 }
  0x14   : > { %p813_p10 = pneg %p1292_p8  ;;  %s244_s11 = sshll.u32 %s1183_s10, 4  ;;  %s1305_s11 = int_to_ptr.vmem [resolvable:$true] %s244_s11 }
  0x15   : > { %s254_s14 = sshll.u32 %s1184_s13, 4  ;;  %s916_s17 = scalar_lea.hbm %s1627_s1, 16  ;;  %s1307_s14 = int_to_ptr.vmem [resolvable:$true] %s254_s14 }
  0x16   : > { %p1301_p11 = pnand %p813_p10, %p1633_p1  ;;  %p917_p12 = scmp.ne.s32.totalorder %s1627_s1, %s916_s17 }
  0x17   : > { %p923_p5 = scmp.lt.u32.totalorder %s916_s17, %s1627_s1 }
  0x18   : > { %p1317_p13 = pneg %p1301_p11 }
  0x1a   : > { %p919_p0 = pnand %p1317_p13, %p917_p12 }
  0x1c   : > { %p920_p3 = pneg %p919_p0 }
  0x1e   : > { %p925_p7 = pnand %p923_p5, %p920_p3 }
  0x20   : > { %928 = shalt.err (!%p925_p7)
}
  0x21   : > { %s929_s13 = scalar_lea.vmem %s234_s9, 16  ;;  %s936_s15 = scalar_lea.vmem %s234_s9, 32 }
  0x22   : > { %p930_p10 = scmp.ne.s32.totalorder %s234_s9, %s929_s13  ;;  %p937_p2 = scmp.lt.s32.totalorder %s234_s9, %s234_s9 }
  0x23   : > { %p938_p6 = scmp.lt.s32.totalorder %s936_s15, %s929_s13 }
  0x24   : > { %p932_p9 = pnand %p930_p10, %p1317_p13 }
  0x25   : > { %p939_p4 = por %p938_p6, %p937_p2 }
  0x26   : > { %p933_p1 = pneg %p932_p9 }
  0x28   : > { %p940_p8 = pnand %p939_p4, %p933_p1 }
  0x2a   : > { %943 = shalt.err (!%p940_p8)
}
  0x2b   : > { %816 = dma.hbm_to_vmem [thread:$0]  (!%p1301_p11), %s1627_s1, 16, %s234_s9, [#allocation6]  }
  0x2c   : > { %s944_s8 = scalar_lea.hbm %s1628_s2, 16 }
  0x2d   : > { %p945_p9 = scmp.ne.s32.totalorder %s1628_s2, %s944_s8  ;;  %p951_p1 = scmp.lt.u32.totalorder %s944_s8, %s1628_s2 }
  0x2f   : > { %p947_p12 = pnand %p945_p9, %p1317_p13 }
  0x31   : > { %p948_p2 = pneg %p947_p12 }
  0x33   : > { %p953_p4 = pnand %p951_p1, %p948_p2 }
  0x35   : > { %956 = shalt.err (!%p953_p4)
}
  0x36   : > { %s957_s9 = scalar_lea.vmem %s1305_s11, 16  ;;  %s964_s28 = scalar_lea.vmem %s1305_s11, 32 }
  0x37   : > { %p958_p6 = scmp.ne.s32.totalorder %s1305_s11, %s957_s9  ;;  %p965_p3 = scmp.lt.s32.totalorder %s1305_s11, %s1305_s11 }
  0x38   : > { %p966_p5 = scmp.lt.s32.totalorder %s964_s28, %s957_s9 }
  0x39   : > { %p960_p8 = pnand %p958_p6, %p1317_p13 }
  0x3a   : > { %p967_p7 = por %p966_p5, %p965_p3 }
  0x3b   : > { %p961_p0 = pneg %p960_p8 }
  0x3d   : > { %p968_p10 = pnand %p967_p7, %p961_p0 }
  0x3f   : > { %971 = shalt.err (!%p968_p10)
}
  0x40   : > { %819 = dma.hbm_to_vmem [thread:$0]  (!%p1301_p11), %s1628_s2, 16, %s1305_s11, [#allocation6]  }
  0x41   : > { %s972_s8 = scalar_lea.hbm %s1629_s3, 256 }
  0x42   : > { %p973_p9 = scmp.ne.s32.totalorder %s1629_s3, %s972_s8  ;;  %p979_p1 = scmp.lt.u32.totalorder %s972_s8, %s1629_s3 }
  0x44   : > { %p975_p12 = pnand %p973_p9, %p1317_p13 }
  0x46   : > { %p976_p2 = pneg %p975_p12 }
  0x48   : > { %p981_p4 = pnand %p979_p1, %p976_p2 }
  0x4a   : > { %984 = shalt.err (!%p981_p4)
}
  0x4b   : > { %s985_s11 = scalar_lea.vmem %s1307_s14, 256  ;;  %p993_p3 = scmp.lt.s32.totalorder %s1307_s14, %s1307_s14 }
  0x4c   : > { %p986_p6 = scmp.ne.s32.totalorder %s1307_s14, %s985_s11  ;;  %p994_p5 = scmp.lt.s32.totalorder %s985_s11, %s985_s11 }
  0x4e   : > { %p988_p8 = pnand %p986_p6, %p1317_p13  ;;  %p995_p7 = por %p994_p5, %p993_p3 }
  0x50   : > { %p989_p0 = pneg %p988_p8 }
  0x52   : > { %p996_p10 = pnand %p995_p7, %p989_p0 }
  0x54   : > { %999 = shalt.err (!%p996_p10)
}
  0x55   : > { %s1185_s28 = smov 64   ;;  %s1186_s20 = smov 4  }
  0x56   : > { %822 = dma.hbm_to_vmem [thread:$0]  (!%p1301_p11), %s1629_s3, 256, %s1307_s14, [#allocation9], %s1185_s28, %s1185_s28, %s1186_s20  }
  0x57   : > { %s49_s17 = sadd.s32 1, %s1168_s23  ;;  %s40_s19 = sadd.s32 1, %s1176_s25 }
  0x58   : > { %p56_p13 = scmp.ne.s32.totalorder %s1168_s23, %s1164_s22  ;;  %p42_p9 = scmp.ge.s32.totalorder %s40_s19, 2 }
  0x59   : > { %p57_p12 = scmp.eq.s32.totalorder %s1180_s26, 0  ;;  %p1646_p2 = scmp.eq.s32.totalorder %s1271_s27, 1 }
  0x5a   : > { %p840_p4 = scmp.lt.s32.totalorder %s1180_s26, 2  ;;  %s1667_s19 = smov (%p42_p9, %s40_s19), 0 }
  0x5b   : > { %p1387_p1 = por %p1646_p2, %p56_p13  ;;  %p58_p6 = por %p57_p12, %p56_p13 }
  0x5c   : > { %s268_s12 = sand.u32 1, %s1168_s23   ;;  %s44_s10 = ssub.s32 %s1176_s25, %s1667_s19 }
  0x5d   : > { %p47_p8 = scmp.eq.s32.totalorder %s44_s10, 0  ;;  %s742_s14 = sshll.u32 %s268_s12, 3 }
  0x5e   : > { %s743_s13 = sshll.u32 %s1176_s25, 7  ;;  %s272_s20 = scalar_lea.vmem [#allocation2], %s742_s14 }
  0x5f   : > { %s1399_s15 = scalar_select %p47_p8, %s1168_s23, %s49_s17  }
  0x60   : > { %s1404_s28 = scalar_lea.hbm %s1626_s0, %s743_s13  ;;  %s280_s16 = sshll.u32 %s272_s20, 4  ;;  %s1406_s16 = int_to_ptr.vmem [resolvable:$true] %s280_s16 }
  0x61   : > { %p1410_p11 = pnand %p840_p4, %p58_p6  ;;  %s269_s17 = scalar_lea.sflag [#allocation3], %s268_s12 }
  0x62   : > { %s1000_s10 = scalar_lea.hbm %s1404_s28, 128  ;;  %s1005_s9 = scalar_lea.hbm %s1626_s0, 256 }
  0x63   : > { %p1001_p0 = scmp.ne.s32.totalorder %s1404_s28, %s1000_s10  ;;  %p1002_p3 = pneg %p1410_p11 }
  0x64   : > { %p1006_p10 = scmp.lt.u32.totalorder %s1404_s28, %s1626_s0  ;;  %p1007_p13 = scmp.lt.u32.totalorder %s1005_s9, %s1000_s10 }
  0x65   : > { %p1003_p5 = pnand %p1002_p3, %p1001_p0  ;;  %p1009_p12 = scmp.lt.u32.totalorder %s1000_s10, %s1404_s28 }
  0x66   : > { %p1008_p9 = por %p1007_p13, %p1006_p10 }
  0x67   : > { %p1004_p7 = pneg %p1003_p5 }
  0x68   : > { %p1010_p2 = por %p1009_p12, %p1008_p9 }
  0x6a   : > { %p1011_p4 = pnand %p1010_p2, %p1004_p7 }
  0x6c   : > { %1014 = shalt.err (!%p1011_p4)
}
  0x6d   : > { %s1015_s12 = scalar_lea.vmem %s1406_s16, 128  ;;  %s1187_s14 = smov [#allocation2]  }
  0x6e   : > { %p1016_p6 = scmp.ne.s32.totalorder %s1406_s16, %s1015_s12  ;;  %s1020_s13 = sshll.u32 %s1187_s14, 4  ;;  %s1021_s13 = int_to_ptr.vmem [resolvable:$false] %s1020_s13 }
  0x6f   : > { %s1022_s11 = scalar_lea.vmem %s1021_s13, 256  ;;  %p1023_p5 = scmp.lt.s32.totalorder %s1406_s16, %s1021_s13 }
  0x70   : > { %p1018_p8 = pnand %p1016_p6, %p1002_p3  ;;  %p1024_p10 = scmp.lt.s32.totalorder %s1022_s11, %s1015_s12 }
  0x72   : > { %p1019_p0 = pneg %p1018_p8  ;;  %p1025_p13 = por %p1024_p10, %p1023_p5 }
  0x74   : > { %p1026_p9 = pnand %p1025_p13, %p1019_p0 }
  0x76   : > { %1029 = shalt.err (!%p1026_p9)
}
  0x77   : > { %826 = dma.hbm_to_vmem [thread:$0]  (!%p1410_p11), %s1404_s28, 128, %s1406_s16, %s269_s17  }
  0x78   : > { %p1649_p7 = scmp.ne.s32.totalorder %s1643_s7, 0 }
  0x79   : > { %s1442_s10 = sand.u32 (!%p1649_p7), 1, %s1164_s22   ;;  %p1650_p3 = scmp.ne.s32.totalorder (!%p1649_p7), %s1641_s29, 0 }
  0x7a   : > { %289 = sbr.rel (%p1649_p7) target bundleno = 854 (0x356), region = 36  ;;  %s745_s9 = sshll.u32 (!%p1649_p7), %s1442_s10, 3 }
  0x7b   : > { %s292_s20 = scalar_lea.sflag (!%p1649_p7), [#allocation3], %s1442_s10  ;;  %s295_s12 = scalar_lea.vmem (!%p1649_p7), [#allocation2], %s745_s9 }
  0x81   : > { %1139 = dma.done.wait (%p1650_p3), %s292_s20, 128  }
  0x82   : > { %1141 = vsyncadd (%p1650_p3), %s292_s20, 4294967168  ;;  %p1651_p12 = scmp.eq.s32.totalorder %s1271_s27, 0 }
  0x84   : > { %1143 = dma.done.wait (%p1651_p12), [#allocation6], 32   ;;  %p1652_p11 = pmov %p1651_p12 }
  0x86   : > { %1145 = vsyncadd (%p1652_p11), [#allocation6], 4294967264  ;;  %p1653_p2 = pmov %p1652_p11 }
  0x88   : > { %1147 = dma.done.wait (%p1653_p2), [#allocation9], 256   ;;  %p1654_p4 = pmov %p1653_p2 }
  0x89   : > { %vm350_vm0 = vcmask 261120   ;;  %v347_v0 = vld [vmem:[%s295_s12] sm:$0xff]  ;;  %v912_v7 = vld [vmem:[#allocation8] sm:$0xff]   ;;  %v1188_v8 = vmov 0.0   ;;  %vm1189_vm1 = vmmov 0   ;;  %s1462_s29 = sshll.u32 %s1442_s10, 4 }
  0x8a   : > { %1149 = vsyncadd (%p1654_p4), [#allocation9], 4294967040  ;;  %v351_v1 = vsel %vm350_vm0, %v347_v0, 0.0  ;;  %785 = vmatprep.subr.bf16.mxu0 %v1188_v8  ;;  %789 = vmatprep.mubr.msk.bf16.mxu0 %vm1189_vm1, %v1188_v8  ;;  %v913_v9 = vld [vmem:[#allocation8 + $0x8] sm:$0xff]   ;;  %v752_v14 = vld [vmem:[#allocation5] ss:$0 sm:$0xff] }
  0x8b   : > { %352 = vadd.xlane.f32.xlu0 %v351_v1  ;;  %786 = vmatpush3.bf16.msra.mxu0 %v912_v7  ;;  %v753_v16 = vld [vmem:[#allocation7] ss:$0 sm:$0xff]  ;;  %vm440_vm2 = vcmask 60416   ;;  %s1190_s7 = smov 80   ;;  %s1191_s28 = smov 96  }
  0x8c   : > { %787 = vmatprep.subr.bf16.mxu0 %v1188_v8  ;;  %s1465_s16 = scalar_lea.vmem [#allocation10], %s1462_s29  ;;  %s1192_s18 = smov 104  }
  0x8d   : > { %s1193_s17 = smov 88   ;;  %s1194_s14 = smov 72  }
  0x8e   : > { %s1637_s13 = smov 64   ;;  %s1196_s11 = smov 120  }
  0x8f   : > { %788 = vmatpush3.bf16.msra.mxu0 %v913_v9  ;;  %s1197_s9 = smov 56   ;;  %s1198_s20 = smov 112  }
  0x90   : > { %s1199_s12 = smov 48  }
 0x118   : > { %v353_v2 = vpop.xlane.xlu0 %352 }
 0x119   : > { %v355_v3 = vmul.f32 0.03125, %v353_v2 }
 0x11b   : > { %v356_v4 = vsub.f32 %v347_v0, %v355_v3 }
 0x11d   : > { %v357_v5 = vmul.f32 %v356_v4, %v356_v4 }
 0x11f   : > { %v358_v6 = vsel %vm350_vm0, %v357_v5, 0.0 }
 0x120   : > { %359 = vadd.xlane.f32.xlu0 %v358_v6 }
 0x1ad   : > { %v360_v10 = vpop.xlane.xlu0 %359 }
 0x1ae   : > { %v361_v11 = vmul.f32 0.03125, %v360_v10 }
 0x1b0   : > { %v362_v12 = vadd.f32 1e-05, %v361_v11 }
 0x1b2   : > { %914 = vrsqrt.f32 %v362_v12 }
 0x1bc   : > { %v915_v13 = vpop.eup %914 }
 0x1bd   : > { %v364_v15 = vmul.f32 %v915_v13, %v356_v4 }
 0x1bf   : > { %v371_v17 = vmul.f32 %v752_v14, %v364_v15 }
 0x1c1   : > { %v378_v18 = vadd.f32 %v753_v16, %v371_v17 }
 0x1c3   : > { %v379_v19 = vpack.c.bf16 %v378_v18, %v378_v18 }
 0x1c5   : > { %790 = vmatmul.mubr.msk.bf16.vlgmr.msra.gmra.mrb[0].mxu0 %vm350_vm0, %v379_v19 }
 0x298   : > { %v433_v20 = vpop.f32.mrb[0].mxu0 }
 0x299   : > { %v439_v21 = vpack.c.bf16 %v433_v20, %v433_v20  ;;  %v791_v22 = vpop.f32.mrb[1].mxu0 }
 0x29a   : > { %v436_v23 = vpop.f32.mrb[2].mxu0 }
 0x29b   : > { %473 = vrot.lane.b32.xlu0 %v439_v21, %s1190_s7  ;;  %445 = vrot.lane.b32.xlu1 %v439_v21, %s1191_s28  ;;  %v792_v24 = vpop.f32.mrb[3].mxu0  ;;  %441 = vst.msk [vmem:[%s1465_s16] sm:$0xf] %vm440_vm2, %v439_v21  ;;  %s1200_s7 = smov 40   ;;  %s338_s28 = scalar_lea.vmem [#allocation11], %s1462_s29 }
 0x29f   : > { %483 = vrot.lane.b32.xlu0 %v439_v21, %s1192_s18  ;;  %458 = vrot.lane.b32.xlu1 %v439_v21, %s1193_s17  ;;  %s540_s18 = sshll.u32 %s338_s28, 4  ;;  %s503_s17 = sand.u32 1, %s1271_s27   ;;  %s1480_s18 = int_to_ptr.vmem [resolvable:$true] %s540_s18 }
 0x2a0   : > { %s1030_s27 = scalar_lea.vmem %s1480_s18, 256 }
 0x2a1   : > { %p1031_p6 = scmp.ne.s32.totalorder %s1480_s18, %s1030_s27 }
 0x2a3   : > { %488 = vrot.lane.b32.xlu1 %v439_v21, %s1194_s14  ;;  %s1475_s14 = sshll.u32 %s1172_s24, 8  ;;  %s1489_s24 = scalar_lea.sflag [#allocation12], %s503_s17 }
 0x2a4   : > { %p1032_p8 = pnand %p1031_p6, %p1387_p1 }
 0x2a6   : > { %p1033_p0 = pneg %p1032_p8 }
 0x2a7   : > { %449 = vrot.lane.b32.xlu1 %v439_v21, %s1637_s13 }
 0x2ab   : > { %453 = vrot.lane.b32.xlu1 %v439_v21, %s1196_s11 }
 0x2af   : > { %463 = vrot.lane.b32.xlu1 %v439_v21, %s1197_s9 }
 0x2b3   : > { %468 = vrot.lane.b32.xlu1 %v439_v21, %s1198_s20  ;;  %s1486_s20 = scalar_lea.hbm %s1631_s5, %s1475_s14 }
 0x2b7   : > { %478 = vrot.lane.b32.xlu1 %v439_v21, %s1199_s12  ;;  %s1201_s12 = smov [#allocation11]  }
 0x2bb   : > { %493 = vrot.lane.b32.xlu1 %v439_v21, %s1200_s7  ;;  %s1034_s7 = sshll.u32 %s1201_s12, 4  ;;  %s1035_s7 = int_to_ptr.vmem [resolvable:$false] %s1034_s7 }
 0x2bc   : > { %s1036_s13 = scalar_lea.vmem %s1035_s7, 512  ;;  %p1037_p5 = scmp.lt.s32.totalorder %s1480_s18, %s1035_s7 }
 0x2bd   : > { %p1038_p10 = scmp.lt.s32.totalorder %s1036_s13, %s1030_s27 }
 0x2bf   : > { %p1039_p13 = por %p1038_p10, %p1037_p5 }
 0x2c1   : > { %p1040_p9 = pnand %p1039_p13, %p1033_p0 }
 0x30d   : > { %v474_v25 = vpop.permute.xlu0 %473  ;;  %v446_v26 = vpop.permute.xlu1 %445 }
 0x30e   : > { %762 = vst.msk [vmem:[%s338_s28 + $0x8] sm:$0xf] %vm440_vm2, %v474_v25  ;;  %448 = vst.msk [vmem:[%s338_s28] sm:$0xf] %vm440_vm2, %v446_v26 }
 0x311   : > { %v484_v27 = vpop.permute.xlu0 %483  ;;  %v459_v28 = vpop.permute.xlu1 %458 }
 0x312   : > { %764 = vst.msk [vmem:[%s1465_s16 + $0xc] sm:$0xf] %vm440_vm2, %v484_v27  ;;  %759 = vst.msk [vmem:[%s338_s28 + $0x4] sm:$0xf] %vm440_vm2, %v459_v28 }
 0x315   : > { %v489_v29 = vpop.permute.xlu1 %488 }
 0x316   : > { %765 = vst.msk [vmem:[%s338_s28 + $0xc] sm:$0xf] %vm440_vm2, %v489_v29 }
 0x317   : > { %1043 = shalt.err (!%p1040_p9)
}
 0x318   : > { %s1044_s28 = scalar_lea.hbm %s1486_s20, 256  ;;  %s1048_s9 = scalar_lea.hbm %s1631_s5, 512 }
 0x319   : > { %p1045_p7 = scmp.ne.s32.totalorder %s1486_s20, %s1044_s28  ;;  %p1049_p11 = scmp.lt.u32.totalorder %s1486_s20, %s1631_s5 }
 0x31a   : > { %p1050_p2 = scmp.lt.u32.totalorder %s1048_s9, %s1044_s28  ;;  %p1052_p6 = scmp.lt.u32.totalorder %s1044_s28, %s1486_s20 }
 0x31b   : > { %p1046_p3 = pnand %p1045_p7, %p1387_p1 }
 0x31c   : > { %p1051_p4 = por %p1050_p2, %p1049_p11 }
 0x31d   : > { %p1047_p12 = pneg %p1046_p3 }
 0x31e   : > { %p1053_p8 = por %p1052_p6, %p1051_p4 }
 0x320   : > { %p1054_p0 = pnand %p1053_p8, %p1047_p12 }
 0x322   : > { %1057 = shalt.err (!%p1054_p0)
}
 0x323   : > { %s1639_s13 = smov 4   ;;  %s1655_s27 = smov 64   ;;  %v450_v30 = vpop.permute.xlu1 %449 }
 0x324   : > { %808 = dma.vmem_to_hbm [thread:$0]  (%p1387_p1), %s1480_s18, 256, %s1486_s20, %s1489_s24, %s1655_s27, %s1655_s27, %s1639_s13  }
 0x325   : > { %s1517_s28 = scalar_lea.vmem [#allocation13], %s1462_s29  ;;  %s523_s17 = sshll.u32 %s1465_s16, 4  ;;  %s1526_s17 = int_to_ptr.vmem [resolvable:$true] %s523_s17 }
 0x326   : > { %452 = vst.msk [vmem:[%s1517_s28] sm:$0xf] %vm440_vm2, %v450_v30  ;;  %s1532_s29 = scalar_lea.hbm %s1630_s4, %s1475_s14  ;;  %s1058_s20 = scalar_lea.vmem %s1526_s17, 256 }
 0x327   : > { %v454_v31 = vpop.permute.xlu1 %453  ;;  %p1059_p5 = scmp.ne.s32.totalorder %s1526_s17, %s1058_s20  ;;  %s1203_s12 = smov [#allocation10]  }
 0x328   : > { %758 = vst.msk [vmem:[%s1465_s16 + $0x4] sm:$0xf] %vm440_vm2, %v454_v31  ;;  %s1062_s7 = sshll.u32 %s1203_s12, 4  ;;  %s1063_s7 = int_to_ptr.vmem [resolvable:$false] %s1062_s7 }
 0x329   : > { %p1060_p10 = pnand %p1059_p5, %p1387_p1  ;;  %s1064_s13 = scalar_lea.vmem %s1063_s7, 512 }
 0x32a   : > { %p1065_p9 = scmp.lt.s32.totalorder %s1526_s17, %s1063_s7  ;;  %p1066_p7 = scmp.lt.s32.totalorder %s1064_s13, %s1058_s20 }
 0x32b   : > { %v464_v32 = vpop.permute.xlu1 %463  ;;  %p1061_p13 = pneg %p1060_p10 }
 0x32c   : > { %760 = vst.msk [vmem:[%s1517_s28 + $0x4] sm:$0xf] %vm440_vm2, %v464_v32  ;;  %p1067_p3 = por %p1066_p7, %p1065_p9 }
 0x32e   : > { %p1068_p12 = pnand %p1067_p3, %p1061_p13 }
 0x32f   : > { %v469_v33 = vpop.permute.xlu1 %468 }
 0x330   : > { %761 = vst.msk [vmem:[%s1465_s16 + $0x8] sm:$0xf] %vm440_vm2, %v469_v33 }
 0x331   : > { %1071 = shalt.err (!%p1068_p12)
}
 0x332   : > { %s1072_s16 = scalar_lea.hbm %s1532_s29, 256  ;;  %s1076_s12 = scalar_lea.hbm %s1630_s4, 512 }
 0x333   : > { %p1073_p11 = scmp.ne.s32.totalorder %s1532_s29, %s1072_s16  ;;  %p1077_p6 = scmp.lt.u32.totalorder %s1532_s29, %s1630_s4 }
 0x334   : > { %p1078_p8 = scmp.lt.u32.totalorder %s1076_s12, %s1072_s16  ;;  %p1080_p5 = scmp.lt.u32.totalorder %s1072_s16, %s1532_s29 }
 0x335   : > { %p1074_p2 = pnand %p1073_p11, %p1387_p1 }
 0x336   : > { %p1079_p0 = por %p1078_p8, %p1077_p6 }
 0x337   : > { %p1075_p4 = pneg %p1074_p2 }
 0x338   : > { %p1081_p10 = por %p1080_p5, %p1079_p0 }
 0x33a   : > { %p1082_p13 = pnand %p1081_p10, %p1075_p4 }
 0x33c   : > { %1085 = shalt.err (!%p1082_p13)
}
 0x33d   : > { %s1656_s13 = smov 4   ;;  %s1657_s20 = scalar_lea.sflag [#allocation4], %s1442_s10  ;;  %v479_v34 = vpop.permute.xlu1 %478 }
 0x33e   : > { %807 = dma.vmem_to_hbm [thread:$0]  (%p1387_p1), %s1526_s17, 256, %s1532_s29, %s1657_s20, %s1655_s27, %s1655_s27, %s1656_s13  }
 0x33f   : > { %s557_s18 = sshll.u32 %s1517_s28, 4  ;;  %763 = vst.msk [vmem:[%s1517_s28 + $0x8] sm:$0xf] %vm440_vm2, %v479_v34  ;;  %s1572_s10 = scalar_lea.hbm %s1632_s6, %s1475_s14  ;;  %s1566_s18 = int_to_ptr.vmem [resolvable:$true] %s557_s18 }
 0x340   : > { %s1086_s9 = scalar_lea.vmem %s1566_s18, 256  ;;  %s1204_s17 = smov [#allocation13]  }
 0x341   : > { %v494_v35 = vpop.permute.xlu1 %493  ;;  %p1087_p9 = scmp.ne.s32.totalorder %s1566_s18, %s1086_s9  ;;  %s1090_s29 = sshll.u32 %s1204_s17, 4  ;;  %s1091_s29 = int_to_ptr.vmem [resolvable:$false] %s1090_s29 }
 0x342   : > { %766 = vst.msk [vmem:[%s1517_s28 + $0xc] sm:$0xf] %vm440_vm2, %v494_v35  ;;  %s1092_s12 = scalar_lea.vmem %s1091_s29, 512  ;;  %p1093_p12 = scmp.lt.s32.totalorder %s1566_s18, %s1091_s29 }
 0x343   : > { %p1088_p7 = pnand %p1087_p9, %p1387_p1  ;;  %p1094_p11 = scmp.lt.s32.totalorder %s1092_s12, %s1086_s9 }
 0x345   : > { %p1089_p3 = pneg %p1088_p7  ;;  %p1095_p2 = por %p1094_p11, %p1093_p12 }
 0x347   : > { %p1096_p4 = pnand %p1095_p2, %p1089_p3 }
 0x349   : > { %1099 = shalt.err (!%p1096_p4)
}
 0x34a   : > { %s1100_s14 = scalar_lea.hbm %s1572_s10, 256  ;;  %s1104_s20 = scalar_lea.hbm %s1632_s6, 512 }
 0x34b   : > { %p1101_p6 = scmp.ne.s32.totalorder %s1572_s10, %s1100_s14  ;;  %p1105_p5 = scmp.lt.u32.totalorder %s1572_s10, %s1632_s6 }
 0x34c   : > { %p1106_p10 = scmp.lt.u32.totalorder %s1104_s20, %s1100_s14  ;;  %p1108_p9 = scmp.lt.u32.totalorder %s1100_s14, %s1572_s10 }
 0x34d   : > { %p1102_p8 = pnand %p1101_p6, %p1387_p1 }
 0x34e   : > { %p1107_p13 = por %p1106_p10, %p1105_p5 }
 0x34f   : > { %p1103_p0 = pneg %p1102_p8 }
 0x350   : > { %p1109_p7 = por %p1108_p9, %p1107_p13 }
 0x352   : > { %p1110_p3 = pnand %p1109_p7, %p1103_p0 }
 0x354   : > { %1113 = shalt.err (!%p1110_p3)
}
 0x355   : > { %809 = dma.vmem_to_hbm [thread:$0]  (%p1387_p1), %s1566_s18, 256, %s1572_s10, %s1489_s24, %s1655_s27, %s1655_s27, %s1656_s13  }
 0x356 PF: > { %s572_s9 = sand.u32 1, %s1160_s21   ;;  %p1658_p12 = scmp.ne.s32.totalorder %s1642_s30, 0 }
 0x357   : > { %p1659_p11 = scmp.ge.s32.totalorder %s1180_s26, 2  ;;  %s573_s17 = scalar_lea.sflag [#allocation4], %s572_s9 }
 0x359   : > { %p828_p2 = pnand %p1659_p11, %p1658_p12 }
 0x35b   : > { %1151 = dma.done.wait (!%p828_p2), %s573_s17, 256  }
 0x35c   : > { %1153 = vsyncadd (!%p828_p2), %s573_s17, 4294967040  ;;  %s1660_s8 = sadd.s32 4294967294, %s1180_s26  }
 0x35d   : > { %s581_s29 = sand.u32 1, %s1660_s8  }
 0x35e   : > { %s582_s12 = scalar_lea.sflag [#allocation12], %s581_s29 }
 0x35f   : > { %1155 = dma.done.wait (!%p828_p2), %s582_s12, 512  }
 0x360   : > { %1157 = vsyncadd (!%p828_p2), %s582_s12, 4294966784  ;;  %s28_s26 = sadd.s32 1, %s1180_s26   ;;  %s1661_s21 = smov %s1164_s22 }
 0x361   : > { %p25_p1 = scmp.ge.s32.totalorder %s28_s26, 4   ;;  %s1662_s22 = smov %s1168_s23 }
 0x362   : > { %s1663_s23 = smov %s1399_s15  ;;  %s1664_s24 = smov %s1176_s25 }
 0x363   : > { %s1665_s25 = smov %s1667_s19  ;;  %27 = sbr.rel (!%p25_p1) target bundleno = 10 (0xa), region = 134 }
 0x36a   :  { %596 = vsyncpa [#allocation3], 1 }
 0x36b   :  { %598 = vsyncpa [#allocation3 + $0x1], 1 }
 0x36c   :  { %599 = vsyncpa [#allocation6], 1 }
 0x36d   :  { %600 = vsyncpa [#allocation9], 1 }
 0x36e   :  { %601 = vsyncpa [#allocation4], 1 }
 0x36f   :  { %603 = vsyncpa [#allocation4 + $0x1], 1 }
 0x370   :  { %604 = vsyncpa [#allocation12], 1 }
 0x371   :  { %606 = vsyncpa [#allocation12 + $0x1], 1 }

</bundles_post_ra>
